<compile_context>
chip_gen: v6e
topology: v6e:2x2x1
jax: 0.10.0
libtpu: 0.0.40
codegen_flags: <defaults>
</compile_context>

<pallas_src>
import functools

import jax
import jax.numpy as jnp
from jax.experimental import pallas as pl
from jax.experimental.pallas import tpu as pltpu


def _grid_attention_kernel(l_ref, gup_ref, wl_ref, wg_ref, wphi_ref, bphi_ref,
                           c_ref, out_ref, *, normalize_attn, inv_spatial):
    """Per-batch-element kernel, channels-on-sublane layout.

    l_ref   : (1, Cl, S) f32    local features (original precision)
    gup_ref : (1, Cg, S) bf16   bilinearly upsampled global features
    wl_ref  : (A, Cl)    bf16   W_l 1x1-conv weight
    wg_ref  : (A, Cg)    bf16   W_g 1x1-conv weight
    wphi_ref: (1, A)     f32    phi 1x1-conv weight
    bphi_ref: (1, 1)     f32    phi bias (SMEM scalar)
    c_ref   : (1, 1, S)  f32    pre-activation attention map (output)
    out_ref : (1, Cl, 1) f32    pooled output features (output)
    """
    l_f32 = l_ref[0]                                                    # (Cl, S)
    g_up = gup_ref[0]                                                   # (Cg, S)

    # relu(W_l @ L + W_g @ G_up): two small MXU matmuls, f32 accumulation.
    h = jnp.dot(wl_ref[...], l_f32.astype(jnp.bfloat16),
                preferred_element_type=jnp.float32)
    h = h + jnp.dot(wg_ref[...], g_up, preferred_element_type=jnp.float32)
    h = jnp.maximum(h, 0.0)                                             # (A, S)

    # phi: 1x1 conv + bias -> lane-dense (1, S) row.
    c = (jnp.dot(wphi_ref[...], h, preferred_element_type=jnp.float32)
         + bphi_ref[0, 0])                                              # (1, S)

    if normalize_attn:
        # Softmax over the spatial (lane) axis, then sum-pool.  Normalization
        # is folded to AFTER the reduction: sum(a*l) == sum(e*l) / sum(e).
        m = jnp.max(c, axis=1, keepdims=True)                           # (1, 1)
        e = jnp.exp(c - m)                                              # (1, S)
        denom = jnp.sum(e, axis=1, keepdims=True)                       # (1, 1)
        num = jnp.sum(e * l_f32, axis=1, keepdims=True)                 # (Cl, 1)
        out = num / denom
    else:
        # Sigmoid gate, then spatial mean (== adaptive_avg_pool2d(., (1, 1))).
        a = jax.nn.sigmoid(c)                                           # (1, S)
        out = jnp.sum(a * l_f32, axis=1, keepdims=True) * inv_spatial   # (Cl, 1)

    c_ref[0] = c
    out_ref[0] = out


def _bilinear_interp_matrix(out_size, in_size):
    """Row-stochastic matrix M (out, in) s.t. M @ x == F.interpolate(x, ...,
    mode='bilinear', align_corners=False) along one axis."""
    i = jnp.arange(out_size, dtype=jnp.float32)
    src = (i + 0.5) * (in_size / out_size) - 0.5
    src = jnp.maximum(src, 0.0)                      # PyTorch clamps negative coords
    i0 = jnp.clip(jnp.floor(src).astype(jnp.int32), 0, in_size - 1)
    i1 = jnp.minimum(i0 + 1, in_size - 1)
    w1 = src - i0.astype(jnp.float32)
    w0 = 1.0 - w1
    m = (w0[:, None] * jax.nn.one_hot(i0, in_size, dtype=jnp.float32)
         + w1[:, None] * jax.nn.one_hot(i1, in_size, dtype=jnp.float32))
    return m                                          # (out, in)


def _bilinear_upsample_nchw(x, factor):
    """Matrix-form bilinear upsample (two small matmuls, no gathers)."""
    n, c, hin, win = x.shape
    my = _bilinear_interp_matrix(hin * factor, hin)   # (Hout, Hin)
    mx = _bilinear_interp_matrix(win * factor, win)   # (Wout, Win)
    x = x.astype(jnp.float32)
    y = jnp.einsum('oh,nchw->ncow', my, x)
    return jnp.einsum('ncow,pw->ncop', y, mx)         # (n, c, Hout, Wout)


def grid_attention_block(l, g, w_l, w_g, w_phi, b_phi, *, up_factor, normalize_attn):
    """JAX/Pallas equivalent of GridAttentionBlock.forward.

    l     : (N, Cl, H, W)   NCHW, like the PyTorch module
    g     : (N, Cg, Hg, Wg) NCHW, with Hg*up_factor == H etc.
    w_l   : (A, Cl, 1, 1)   conv weight of W_l (no bias)
    w_g   : (A, Cg, 1, 1)   conv weight of W_g (no bias)
    w_phi : (1, A, 1, 1)    conv weight of phi
    b_phi : (1,)            conv bias of phi
    returns (c, output) with c: (N, 1, H, W), output: (N, Cl)
    """
    n, cl, h, w = l.shape
    cg = g.shape[1]
    a_feat = w_l.shape[0]
    s = h * w

    if up_factor > 1:
        # Commutes exactly with the bias-free 1x1 conv W_g, so upsampling the
        # raw Cg-channel features first is equivalent to PyTorch's
        # interpolate(W_g(g)) and moves less data (Cg < A).
        g = _bilinear_upsample_nchw(g, up_factor)

    # NCHW -> (N, C, S): pure reshapes, no HBM transpose.  `l` stays f32 (read
    # once, exact values reused for the pooling); the bf16 cast of `g` fuses
    # into the upsample einsum.
    l_ncs = l.reshape(n, cl, s).astype(jnp.float32)
    g_ncs = g.reshape(n, cg, s).astype(jnp.bfloat16)

    # 1x1-conv weights in channel-matmul form.
    wl_m = w_l.reshape(a_feat, cl).astype(jnp.bfloat16)      # (A, Cl)
    wg_m = w_g.reshape(a_feat, cg).astype(jnp.bfloat16)      # (A, Cg)
    wphi_m = w_phi.reshape(1, a_feat).astype(jnp.float32)    # (1, A)
    bphi_m = b_phi.reshape(1, 1).astype(jnp.float32)         # (1, 1) -> SMEM

    kernel = functools.partial(
        _grid_attention_kernel,
        normalize_attn=normalize_attn,
        inv_spatial=1.0 / float(s),
    )

    # TODO(synk): for very large S, tile the spatial axis with a second
    # ("arbitrary") grid dimension, an accumulator scratch and an online
    # softmax; a single S block is used here since S easily fits VMEM.
    c_row, out = pl.pallas_call(
        kernel,
        out_shape=(
            jax.ShapeDtypeStruct((n, 1, s), jnp.float32),
            jax.ShapeDtypeStruct((n, cl, 1), jnp.float32),
        ),
        grid_spec=pltpu.PrefetchScalarGridSpec(
            num_scalar_prefetch=0,
            grid=(n,),
            in_specs=[
                pl.BlockSpec((1, cl, s), lambda b: (b, 0, 0)),           # local feats
                pl.BlockSpec((1, cg, s), lambda b: (b, 0, 0)),           # upsampled global
                pl.BlockSpec((a_feat, cl), lambda b: (0, 0)),            # W_l
                pl.BlockSpec((a_feat, cg), lambda b: (0, 0)),            # W_g
                pl.BlockSpec((1, a_feat), lambda b: (0, 0)),             # w_phi
                pl.BlockSpec(memory_space=pltpu.MemorySpace.SMEM),       # b_phi scalar
            ],
            out_specs=[
                pl.BlockSpec((1, 1, s), lambda b: (b, 0, 0)),            # c (lane-dense)
                pl.BlockSpec((1, cl, 1), lambda b: (b, 0, 0)),           # pooled output
            ],
        ),
        compiler_params=pltpu.CompilerParams(
            dimension_semantics=("parallel",),
        ),
    )(l_ncs, g_ncs, wl_m, wg_m, wphi_m, bphi_m)

    c_nchw = c_row.reshape(n, 1, h, w)    # (N, 1, H, W)
    output = out.reshape(n, cl)           # (N, Cl)
    return c_nchw, output


if __name__ == "__main__":
    # Module config: in_features_l=4, in_features_g=8, attn_features=16, up_factor=2
    N, CL, CG, A = 2, 4, 8, 16
    H = W = 16
    UP = 2

    key = jax.random.PRNGKey(0)
    k_l, k_g, k_wl, k_wg, k_wphi, k_bphi = jax.random.split(key, 6)

    l = jax.random.normal(k_l, (N, CL, H, W), dtype=jnp.float32)
    g = jax.random.normal(k_g, (N, CG, H // UP, W // UP), dtype=jnp.float32)

    # Deterministic synthetic parameters (Conv2d-shaped, kernel_size=1)
    w_l = 0.1 * jax.random.normal(k_wl, (A, CL, 1, 1), dtype=jnp.float32)
    w_g = 0.1 * jax.random.normal(k_wg, (A, CG, 1, 1), dtype=jnp.float32)
    w_phi = 0.1 * jax.random.normal(k_wphi, (1, A, 1, 1), dtype=jnp.float32)
    b_phi = 0.1 * jax.random.normal(k_bphi, (1,), dtype=jnp.float32)

    # normalize_attn = False path (sigmoid + adaptive_avg_pool2d)
    c0, out0 = grid_attention_block(l, g, w_l, w_g, w_phi, b_phi,
                                    up_factor=UP, normalize_attn=False)
    # normalize_attn = True path (softmax + spatial sum)
    c1, out1 = grid_attention_block(l, g, w_l, w_g, w_phi, b_phi,
                                    up_factor=UP, normalize_attn=True)

    jax.block_until_ready((c0, out0, c1, out1))

    assert c0.shape == (N, 1, H, W) and out0.shape == (N, CL)
    assert c1.shape == (N, 1, H, W) and out1.shape == (N, CL)
    print("KERNEL_OK")
</pallas_src>

<mosaic_0001>
module attributes {stable_mosaic.version = 11 : i64} {
  func.func @_grid_attention_kernel(%arg0: i32, %arg1: memref<1x4x256xf32, #tpu.memory_space<vmem>>, %arg2: memref<1x8x256xbf16, #tpu.memory_space<vmem>>, %arg3: memref<16x4xbf16, #tpu.memory_space<vmem>>, %arg4: memref<16x8xbf16, #tpu.memory_space<vmem>>, %arg5: memref<1x16xf32, #tpu.memory_space<vmem>>, %arg6: memref<1x1xf32, #tpu.memory_space<smem>>, %arg7: memref<1x1x256xf32, #tpu.memory_space<vmem>>, %arg8: memref<1x4x1xf32, #tpu.memory_space<vmem>>) attributes {dimension_semantics = [#tpu.dimension_semantics<parallel>], iteration_bounds = array<i64: 2>, scalar_prefetch = 0 : i64, scratch_operands = 0 : i64, tpu.core_type = #tpu.core_type<tc>, window_params = [{transform_indices = @transform_0, window_bounds = array<i64: 1, 4, 256>}, {transform_indices = @transform_1, window_bounds = array<i64: 1, 8, 256>}, {pipeline_mode = #tpu.pipeline_mode<synchronous>, transform_indices = @transform_2, window_bounds = array<i64: 16, 4>}, {pipeline_mode = #tpu.pipeline_mode<synchronous>, transform_indices = @transform_3, window_bounds = array<i64: 16, 8>}, {pipeline_mode = #tpu.pipeline_mode<synchronous>, transform_indices = @transform_4, window_bounds = array<i64: 1, 16>}, {transform_indices = @transform_5, window_bounds = array<i64: 1, 1>}, {transform_indices = @transform_6, window_bounds = array<i64: 1, 1, 256>}, {transform_indices = @transform_7, window_bounds = array<i64: 1, 4, 1>}]} {
    %c0 = arith.constant 0 : index
    %c0_0 = arith.constant 0 : index
    %c0_1 = arith.constant 0 : index
    %0 = vector.load %arg1[%c0, %c0_0, %c0_1] : memref<1x4x256xf32, #tpu.memory_space<vmem>>, vector<1x4x256xf32>
    %1 = vector.shape_cast %0 : vector<1x4x256xf32> to vector<4x256xf32>
    %c0_2 = arith.constant 0 : index
    %c0_3 = arith.constant 0 : index
    %c0_4 = arith.constant 0 : index
    %2 = vector.load %arg2[%c0_2, %c0_3, %c0_4] : memref<1x8x256xbf16, #tpu.memory_space<vmem>>, vector<1x8x256xbf16>
    %3 = vector.shape_cast %2 : vector<1x8x256xbf16> to vector<8x256xbf16>
    %c0_5 = arith.constant 0 : index
    %c0_6 = arith.constant 0 : index
    %4 = vector.load %arg3[%c0_5, %c0_6] : memref<16x4xbf16, #tpu.memory_space<vmem>>, vector<16x4xbf16>
    %5 = arith.truncf %1 : vector<4x256xf32> to vector<4x256xbf16>
    %cst = arith.constant dense<0.000000e+00> : vector<16x256xf32>
    %6 = tpu.matmul %4, %5, %cst {dimension_numbers = #tpu.dot_dimension_numbers<[1], [0], [0], [1], [0, 0, 1, 1], [], []>} : vector<16x4xbf16>, vector<4x256xbf16>, vector<16x256xf32> -> vector<16x256xf32>
    %c0_7 = arith.constant 0 : index
    %c0_8 = arith.constant 0 : index
    %7 = vector.load %arg4[%c0_7, %c0_8] : memref<16x8xbf16, #tpu.memory_space<vmem>>, vector<16x8xbf16>
    %cst_9 = arith.constant dense<0.000000e+00> : vector<16x256xf32>
    %8 = tpu.matmul %7, %3, %cst_9 {dimension_numbers = #tpu.dot_dimension_numbers<[1], [0], [0], [1], [0, 0, 1, 1], [], []>} : vector<16x8xbf16>, vector<8x256xbf16>, vector<16x256xf32> -> vector<16x256xf32>
    %9 = arith.addf %6, %8 : vector<16x256xf32>
    %cst_10 = arith.constant 0.000000e+00 : f32
    %10 = vector.broadcast %cst_10 : f32 to vector<16x256xf32>
    %11 = arith.maximumf %9, %10 : vector<16x256xf32>
    %c0_11 = arith.constant 0 : index
    %c0_12 = arith.constant 0 : index
    %12 = vector.load %arg5[%c0_11, %c0_12] : memref<1x16xf32, #tpu.memory_space<vmem>>, vector<1x16xf32>
    %cst_13 = arith.constant dense<0.000000e+00> : vector<1x256xf32>
    %13 = tpu.matmul %12, %11, %cst_13 {dimension_numbers = #tpu.dot_dimension_numbers<[1], [0], [0], [1], [0, 0, 1, 1], [], []>} : vector<1x16xf32>, vector<16x256xf32>, vector<1x256xf32> -> vector<1x256xf32>
    %c0_14 = arith.constant 0 : index
    %c0_15 = arith.constant 0 : index
    %14 = memref.load %arg6[%c0_14, %c0_15] : memref<1x1xf32, #tpu.memory_space<smem>>
    %15 = vector.broadcast %14 : f32 to vector<1x256xf32>
    %16 = arith.addf %13, %15 : vector<1x256xf32>
    %17 = arith.negf %16 : vector<1x256xf32>
    %18 = math.exp %17 : vector<1x256xf32>
    %cst_16 = arith.constant 1.000000e+00 : f32
    %19 = vector.broadcast %cst_16 : f32 to vector<1x256xf32>
    %20 = arith.addf %19, %18 : vector<1x256xf32>
    %21 = arith.divf %19, %20 : vector<1x256xf32>
    %22 = vector.broadcast %21 : vector<1x256xf32> to vector<4x256xf32>
    %23 = arith.mulf %22, %1 : vector<4x256xf32>
    %cst_17 = arith.constant dense<0.000000e+00> : vector<4xf32>
    %24 = vector.multi_reduction <add>, %23, %cst_17 [1] : vector<4x256xf32> to vector<4xf32>
    %25 = vector.shape_cast %24 : vector<4xf32> to vector<4x1xf32>
    %cst_18 = arith.constant 3.906250e-03 : f32
    %26 = vector.broadcast %cst_18 : f32 to vector<4x1xf32>
    %27 = arith.mulf %25, %26 : vector<4x1xf32>
    %c0_19 = arith.constant 0 : index
    %c0_20 = arith.constant 0 : index
    %c0_21 = arith.constant 0 : index
    %28 = vector.load %arg7[%c0_19, %c0_20, %c0_21] : memref<1x1x256xf32, #tpu.memory_space<vmem>>, vector<1x1x256xf32>
    %29 = vector.shape_cast %28 : vector<1x1x256xf32> to vector<1x256xf32>
    %30 = vector.shape_cast %16 : vector<1x256xf32> to vector<1x1x256xf32>
    tpu.vector_store %arg7[%c0_19, %c0_20, %c0_21], %30 {strides = array<i32>} : memref<1x1x256xf32, #tpu.memory_space<vmem>>, vector<1x1x256xf32>,
    %c0_22 = arith.constant 0 : index
    %c0_23 = arith.constant 0 : index
    %c0_24 = arith.constant 0 : index
    %31 = vector.load %arg8[%c0_22, %c0_23, %c0_24] : memref<1x4x1xf32, #tpu.memory_space<vmem>>, vector<1x4x1xf32>
    %32 = vector.shape_cast %31 : vector<1x4x1xf32> to vector<4x1xf32>
    %33 = vector.shape_cast %27 : vector<4x1xf32> to vector<1x4x1xf32>
    tpu.vector_store %arg8[%c0_22, %c0_23, %c0_24], %33 {strides = array<i32>} : memref<1x4x1xf32, #tpu.memory_space<vmem>>, vector<1x4x1xf32>,
    return
  }
  func.func @transform_0(%arg0: i32) -> (i32, i32, i32) {
    %c0_i32 = arith.constant 0 : i32
    %c0_i32_0 = arith.constant 0 : i32
    %c0_i32_1 = arith.constant 0 : i32
    return %arg0, %c0_i32, %c0_i32_0 : i32, i32, i32
  }
  func.func @transform_1(%arg0: i32) -> (i32, i32, i32) {
    %c0_i32 = arith.constant 0 : i32
    %c0_i32_0 = arith.constant 0 : i32
    %c0_i32_1 = arith.constant 0 : i32
    return %arg0, %c0_i32, %c0_i32_0 : i32, i32, i32
  }
  func.func @transform_2(%arg0: i32) -> (i32, i32) {
    %c0_i32 = arith.constant 0 : i32
    %c0_i32_0 = arith.constant 0 : i32
    %c0_i32_1 = arith.constant 0 : i32
    return %c0_i32, %c0_i32_0 : i32, i32
  }
  func.func @transform_3(%arg0: i32) -> (i32, i32) {
    %c0_i32 = arith.constant 0 : i32
    %c0_i32_0 = arith.constant 0 : i32
    %c0_i32_1 = arith.constant 0 : i32
    return %c0_i32, %c0_i32_0 : i32, i32
  }
  func.func @transform_4(%arg0: i32) -> (i32, i32) {
    %c0_i32 = arith.constant 0 : i32
    %c0_i32_0 = arith.constant 0 : i32
    %c0_i32_1 = arith.constant 0 : i32
    return %c0_i32, %c0_i32_0 : i32, i32
  }
  func.func @transform_5(%arg0: i32) -> (i32, i32) {
    %c0_i32 = arith.constant 0 : i32
    %c0_i32_0 = arith.constant 0 : i32
    %c0_i32_1 = arith.constant 0 : i32
    return %c0_i32, %c0_i32_0 : i32, i32
  }
  func.func @transform_6(%arg0: i32) -> (i32, i32, i32) {
    %c0_i32 = arith.constant 0 : i32
    %c0_i32_0 = arith.constant 0 : i32
    %c0_i32_1 = arith.constant 0 : i32
    return %arg0, %c0_i32, %c0_i32_0 : i32, i32, i32
  }
  func.func @transform_7(%arg0: i32) -> (i32, i32, i32) {
    %c0_i32 = arith.constant 0 : i32
    %c0_i32_0 = arith.constant 0 : i32
    %c0_i32_1 = arith.constant 0 : i32
    return %arg0, %c0_i32, %c0_i32_0 : i32, i32, i32
  }
}

</mosaic_0001>

<bundles_post_ra>
// kernel: tpu_custom_call.1
= control target key start
LH: loop header
LB: loop body
LE: loop exit
PB: predicated region body
PF: predicated region fallthrough
CT: control target
= control target key end

     0   :  { %s1139_s0 = inlined_call_operand.vmem [shape: f32[2,4,256], index: 0, kind: input, shape index: {}]   ;;  %s1140_s1 = inlined_call_operand.hbm [shape: bf16[2,8,256], index: 1, kind: input, shape index: {}]   ;;  %s1141_s2 = inlined_call_operand.vmem [shape: bf16[16,4], index: 2, kind: input, shape index: {}]   ;;  %s1142_s3 = inlined_call_operand.vmem [shape: bf16[16,8], index: 3, kind: input, shape index: {}]   ;;  %s1143_s4 = inlined_call_operand.vmem [shape: f32[1,16], index: 4, kind: input, shape index: {}]   ;;  %s1144_s5 = inlined_call_operand.<no memory space> [shape: f32[1,1], index: 5, kind: input, shape index: {}]   ;;  %s1145_s6 = inlined_call_operand.hbm [shape: f32[2,1,256], index: 6, kind: output, shape index: {0}]   ;;  %s1146_s7 = inlined_call_operand.vmem [shape: f32[2,4,1], index: 7, kind: output, shape index: {1}]  }
   0x1   :  { %13 = sst [smem:[#allocation2]] %s1144_s5 }
   0x2   :  { %14 = vsyncpa [#allocation4], 0 }
   0x3   :  { %16 = vsyncpa [#allocation4 + $0x1], 0 }
   0x4   :  { %17 = vsyncpa [#allocation5], 0 }
   0x5   :  { %19 = vsyncpa [#allocation5 + $0x1], 0  ;;  %s960_s26 = smov 0   ;;  %s962_s27 = smov 0  }
   0x6   :  { %s964_s28 = smov 0   ;;  %s966_s29 = smov 0  }
   0x7 LB: > { %s981_s5 = sadd.s32 4294967295, %s910_s29   ;;  %s725_s30 = sadd.s32 4294967294, %s910_s29   ;;  %s910_s29 = sphi %s966_s29, %s1163_s29   ;;  %s906_s28 = sphi %s964_s28, %s1162_s28   ;;  %s902_s27 = sphi %s962_s27, %s1161_s27   ;;  %s898_s26 = sphi %s960_s26, %s1160_s26  }
   0x8   : > { %s985_s8 = sadd.s32 1, %s910_s29   ;;  %s58_s9 = sadd.s32 1, %s906_s28 }
   0x9   : > { %s55_s10 = ssub.s32 %s910_s29, %s985_s8  ;;  %p65_p0 = scmp.ne.s32.totalorder %s906_s28, %s902_s27 }
   0xa   : > { %p56_p1 = scmp.eq.s32.totalorder %s55_s10, 0  ;;  %p66_p2 = scmp.eq.s32.totalorder %s910_s29, 0 }
   0xb   : > { %p71_p3 = scmp.ne.s32.totalorder %s902_s27, %s898_s26  ;;  %p72_p4 = scmp.eq.s32.totalorder %s981_s5, 0 }
   0xc   : > { %s997_s11 = scalar_select %p56_p1, %s906_s28, %s58_s9  }
   0xd   : > { %p999_p5 = por %p66_p2, %p65_p0  ;;  %p1003_p6 = por %p72_p4, %p71_p3 }
   0xe   : > { %p179_p7 = scmp.eq.s32.totalorder %s981_s5, 1  ;;  %p185_p8 = scmp.eq.s32.totalorder %s725_s30, 1 }
   0xf   : > { %s1150_s13 = scalar_select %p1003_p6, 1, 0 }
  0x10   : > { %p768_p10 = scmp.lt.s32.totalorder %s910_s29, 2  ;;  %p1010_p11 = por %p179_p7, %p65_p0 }
  0x11   : > { %p1014_p12 = por %p185_p8, %p71_p3  ;;  %s251_s16 = sand.u32 1, %s906_s28  }
  0x12   : > { %s1151_s14 = scalar_select %p1010_p11, 1, 0 }
  0x13   : > { %s1152_s15 = scalar_select %p1014_p12, 1, 0 }
  0x14   : > { %s753_s17 = sshll.u32 %s910_s29, 7  ;;  %s728_s18 = sshll.u32 %s251_s16, 3 }
  0x15   : > { %s1023_s21 = scalar_lea.hbm %s1140_s1, %s753_s17  ;;  %s255_s22 = scalar_lea.vmem [#allocation3], %s728_s18 }
  0x16   : > { %s263_s23 = sshll.u32 %s255_s22, 4  ;;  %p1027_p13 = pnand %p768_p10, %p999_p5  ;;  %s1031_s23 = int_to_ptr.vmem [resolvable:$true] %s263_s23 }
  0x17   : > { %s252_s25 = scalar_lea.sflag [#allocation4], %s251_s16  ;;  %s818_s30 = scalar_lea.hbm %s1023_s21, 128 }
  0x18   : > { %p819_p2 = scmp.ne.s32.totalorder %s1023_s21, %s818_s30  ;;  %p820_p3 = pneg %p1027_p13 }
  0x19   : > { %s823_s12 = scalar_lea.hbm %s1140_s1, 256  ;;  %p824_p5 = scmp.lt.s32.totalorder %s1023_s21, %s1140_s1 }
  0x1a   : > { %p821_p4 = pnand %p820_p3, %p819_p2  ;;  %p825_p8 = scmp.lt.s32.totalorder %s823_s12, %s818_s30 }
  0x1c   : > { %p822_p7 = pneg %p821_p4  ;;  %p826_p10 = por %p825_p8, %p824_p5 }
  0x1e   : > { %p827_p9 = pnand %p826_p10, %p822_p7 }
  0x20   : > { %830 = shalt.err (!%p827_p9)
}
  0x21   : > { %s831_s16 = scalar_lea.vmem %s1031_s23, 128  ;;  %s912_s19 = smov [#allocation3]  }
  0x22   : > { %p832_p0 = scmp.ne.s32.totalorder %s1031_s23, %s831_s16  ;;  %s836_s20 = sshll.u32 %s912_s19, 4  ;;  %s837_s20 = int_to_ptr.vmem [resolvable:$false] %s836_s20 }
  0x23   : > { %s838_s22 = scalar_lea.vmem %s837_s20, 256  ;;  %p839_p4 = scmp.lt.s32.totalorder %s1031_s23, %s837_s20 }
  0x24   : > { %p834_p1 = pnand %p832_p0, %p820_p3  ;;  %p840_p12 = scmp.lt.s32.totalorder %s838_s22, %s831_s16 }
  0x26   : > { %p835_p2 = pneg %p834_p1  ;;  %p841_p11 = por %p840_p12, %p839_p4 }
  0x28   : > { %p842_p6 = pnand %p841_p11, %p835_p2 }
  0x2a   : > { %845 = shalt.err (!%p842_p6)
}
  0x2b   : > { %763 = dma.hbm_to_vmem [thread:$0]  (!%p1027_p13), %s1023_s21, 128, %s1031_s23, %s252_s25  }
  0x2c   : > { %p1154_p9 = scmp.lt.s32.totalorder %s910_s29, 3  ;;  %p1155_p7 = scmp.ge.s32.totalorder %s910_s29, 1 }
  0x2e   : > { %p269_p0 = pnand %p1155_p7, %p1154_p9 }
  0x2f   : > { %s1058_s30 = sand.u32 (!%p269_p0), 1, %s902_s27   ;;  %p1156_p6 = scmp.ne.s32.totalorder (!%p269_p0), %s1150_s13, 0 }
  0x30   : > { %272 = sbr.rel (%p269_p0) target bundleno = 653 (0x28d), region = 44  ;;  %s732_s9 = sshll.u32 (!%p269_p0), %s1058_s30, 3 }
  0x31   : > { %s275_s10 = scalar_lea.sflag (!%p269_p0), [#allocation4], %s1058_s30  ;;  %s278_s12 = scalar_lea.vmem (!%p269_p0), [#allocation3], %s732_s9 }
  0x35   : > { %889 = dma.done.wait (%p1156_p6), %s275_s10, 128  }
  0x36   : > { %891 = vsyncadd (%p1156_p6), %s275_s10, 4294967168  ;;  %p318_p11 = scmp.lt.s32.totalorder %s981_s5, 1  ;;  %v913_v0 = vmov 0   ;;  %v329_v1 = vld [vmem:[%s278_s12] sm:$0xff]  ;;  %vm353_vm0 = vcmask 1043456   ;;  %vm412_vm1 = vcmask 1041408   ;;  %v556_v30 = vlaneseq }
  0x37   : > { %392 = vmatprep.mubr.bf16.mxu0 %v913_v0  ;;  %451 = vmatprep.mubr.bf16.mxu1 %v913_v0  ;;  %v739_v3 = vcombine.high %v329_v1, %v329_v1  ;;  %v738_v4 = vcombine.low %v329_v1, %v329_v1  ;;  %v808_v10 = vld [vmem:[%s1142_s3] sm:$0xff]   ;;  %vm349_vm2 = vcmask 64512   ;;  %vm408_vm3 = vcmask 31744   ;;  %s467_s9 = sld [smem:[#allocation2]]  ;;  %s733_s10 = sshll.u32 %s1058_s30, 1 }
  0x38   : > { %s1068_s21 = scalar_select %p318_p11, %s981_s5, 1  ;;  %v809_v11 = vld [vmem:[%s1141_s2] sm:$0xff]   ;;  %v914_v12 = vmov 0.0   ;;  %vm469_vm4 = vcmask 130048   ;;  %v915_v31 = vmov 1966171168  }
  0x39   : > { %740 = vmatprep.subr.msk.bf16.mxu0 %vm353_vm0, %v739_v3  ;;  %v355_v7 = vsel %vm353_vm0, %v738_v4, 0  ;;  %v466_v29 = vld [vmem:[%s1143_s4] sm:$0x1]  ;;  %v576_v32 = vunpack.c.l.s4 %v915_v31  ;;  %v557_v34 = vshrl.u32 %v556_v30, 7  ;;  %vm592_vm5 = vcmp.lt.s32.totalorder %v556_v30, 256  ;;  %s311_s12 = scalar_lea.vmem [#allocation6], %s733_s10 }
  0x3a   : > { %s754_s23 = sshll.u32 %s1068_s21, 3  ;;  %375 = vmatpush1.bf16.msra.mxu0 %v355_v7  ;;  %s616_s24 = sshll.u32 %s311_s12, 4  ;;  %s617_s24 = int_to_ptr.vmem [resolvable:$true] %s616_s24 }
  0x3b   : > { %s322_s17 = scalar_lea.vmem %s1139_s0, %s754_s23  ;;  %v577_v35 = vunpack.c.0.s8 %v576_v32  ;;  %v558_v50 = vsub.s32 0, %v557_v34  ;;  %s755_s23 = sshll.u32 %s981_s5, 5 }
  0x3c   : > { %v1074_v2 = vld [vmem:[%s322_s17] sm:$0xff]  ;;  %s614_s13 = scalar_lea.hbm %s1145_s6, %s755_s23  ;;  %s598_s18 = scalar_lea.sflag [#allocation5], %s1058_s30 }
  0x3d   : > { %v1078_v5 = vcombine.high %v1074_v2, %v1074_v2  ;;  %v335_v6 = vpack.c.bf16 %v1074_v2, %v1074_v2  ;;  %741 = vmatmul.mubr.msk.bf16.vlgmr.msra.gmra.mxu0 %vm349_vm2, %v808_v10  ;;  %v468_v33 = vstv %s467_s9  ;;  %v580_v41 = vsub.s32 %v577_v35, %v557_v34  ;;  %s846_s16 = scalar_lea.vmem %s617_s24, 32  ;;  %p1157_p13 = scmp.ne.s32.totalorder %s1151_s14, 0 }
  0x3e   : > { %537 = vmatprep.mubr.f32.mxu0 %v914_v12  ;;  %p847_p12 = scmp.ne.s32.totalorder %s617_s24, %s846_s16  ;;  %s916_s19 = smov [#allocation6]  }
  0x3f   : > { %v336_v8 = vpack.c.bf16 %v1078_v5, %v1078_v5  ;;  %v414_v9 = vsel %vm412_vm1, %v335_v6, 0  ;;  %s850_s20 = sshll.u32 %s916_s19, 4  ;;  %s851_s20 = int_to_ptr.vmem [resolvable:$false] %s850_s20 }
  0x40   : > { %p848_p1 = pnand %p847_p12, %p1157_p13  ;;  %s852_s22 = scalar_lea.vmem %s851_s20, 64 }
  0x41   : > { %743 = vmatprep.subr.msk.bf16.mxu1 %vm412_vm1, %v336_v8  ;;  %p853_p5 = scmp.lt.s32.totalorder %s617_s24, %s851_s20  ;;  %p854_p8 = scmp.lt.s32.totalorder %s852_s22, %s846_s16 }
  0x42   : > { %434 = vmatpush1.bf16.msra.mxu1 %v414_v9  ;;  %p849_p3 = pneg %p848_p1 }
  0x43   : > { %p855_p10 = por %p854_p8, %p853_p5 }
  0x45   : > { %744 = vmatmul.mubr.msk.bf16.vlgmr.msra.gmra.mxu1 %vm408_vm3, %v809_v11  ;;  %p856_p2 = pnand %p855_p10, %p849_p3 }
  0xfd   : > { %v394_v13 = vpop.f32.mrf.mxu0 }
  0xff   : > { %v396_v14 = vpop.f32.mrf.mxu0 }
 0x101   : > { %v398_v16 = vpop.f32.mrf.mxu0 }
 0x103   : > { %v400_v19 = vpop.f32.mrf.mxu0 }
 0x105   : > { %v453_v15 = vpop.f32.mrf.mxu1 }
 0x106   : > { %v454_v24 = vadd.f32 %v453_v15, %v394_v13 }
 0x107   : > { %v455_v17 = vpop.f32.mrf.mxu1 }
 0x108   : > { %v456_v22 = vadd.f32 %v455_v17, %v396_v14  ;;  %v462_v28 = vmax.f32 %v454_v24, 0.0 }
 0x109   : > { %v457_v18 = vpop.f32.mrf.mxu1 }
 0x10a   : > { %v458_v20 = vadd.f32 %v457_v18, %v398_v16  ;;  %v463_v27 = vmax.f32 %v456_v22, 0.0 }
 0x10b   : > { %v459_v21 = vpop.f32.mrf.mxu1 }
 0x10c   : > { %v460_v23 = vadd.f32 %v459_v21, %v400_v19  ;;  %v464_v26 = vmax.f32 %v458_v20, 0.0 }
 0x10e   : > { %v465_v25 = vmax.f32 %v460_v23, 0.0 }
 0x110   : > { %501 = vmatprep.subr.mxu0 %v465_v25 }
 0x111   : > { %502 = vmatpush1.msra.mxu0 %v464_v26 }
 0x112   : > { %503 = vmatprep.subr.mxu0 %v463_v27 }
 0x113   : > { %504 = vmatpush1.msra.mxu0 %v462_v28 }
 0x114   : > { %745 = vmatmul.mubr.msk.f32.vlgmr.msra.gmra.mxu0 %vm469_vm4, %v466_v29 }
 0x1d4   : > { %v539_v36 = vpop.f32.mrf.mxu0 }
 0x1d5   : > { %v540_v37 = vadd.f32 %v539_v36, %v468_v33 }
 0x1d6   : > { %v541_v38 = vpop.f32.mrf.mxu0 }
 0x1d7   : > { %v746_v39 = vmul.f32 -1.442695, %v540_v37  ;;  %v542_v40 = vadd.f32 %v541_v38, %v468_v33 }
 0x1d9   : > { %810 = vpow2.f32 %v746_v39  ;;  %v747_v42 = vmul.f32 -1.442695, %v542_v40  ;;  %v574_v43 = vcombine.low %v540_v37, %v542_v40 }
 0x1db   : > { %812 = vpow2.f32 %v747_v42  ;;  %v581_v44 = vrot.slane %v574_v43, %v580_v41 }
 0x1dd   : > { %v588_v45 = vrot.slane %v581_v44, %v580_v41 }
 0x1df   : > { %594 = vst.msk [vmem:[%s311_s12] sm:$0x3] %vm592_vm5, %v588_v45 }
 0x1e6   : > { %v811_v46 = vpop.eup %810 }
 0x1e7   : > { %v550_v47 = vadd.f32 1.0, %v811_v46 }
 0x1e8   : > { %v813_v48 = vpop.eup %812 }
 0x1e9   : > { %814 = vrcp.f32 %v550_v47  ;;  %v551_v49 = vadd.f32 1.0, %v813_v48 }
 0x1eb   : > { %816 = vrcp.f32 %v551_v49 }
 0x1f6   : > { %v815_v51 = vpop.eup %814 }
 0x1f7   : > { %v559_v52 = vrot.slane %v815_v51, %v558_v50 }
 0x1f8   : > { %v817_v53 = vpop.eup %816 }
 0x1f9   : > { %v563_v54 = vrot.slane %v817_v53, %v558_v50  ;;  %v564_v55 = vmul.f32 %v559_v52, %v1074_v2 }
 0x1fb   : > { %v565_v56 = vmul.f32 %v563_v54, %v1078_v5  ;;  %v566_v57 = vsel %vm353_vm0, %v564_v55, 0.0 }
 0x1fd   : > { %v567_v58 = vsel %vm353_vm0, %v565_v56, 0.0 }
 0x1fe   : > { %v568_v59 = vadd.f32 %v567_v58, %v566_v57 }
 0x200   : > { %569 = vadd.xlane.f32.xlu0 %v568_v59 }
 0x201   : > { %859 = shalt.err (!%p856_p2)
}
 0x202   : > { %s860_s5 = scalar_lea.hbm %s614_s13, 32  ;;  %s864_s10 = scalar_lea.hbm %s1145_s6, 64 }
 0x203   : > { %p861_p4 = scmp.ne.s32.totalorder %s614_s13, %s860_s5  ;;  %p865_p0 = scmp.lt.s32.totalorder %s614_s13, %s1145_s6 }
 0x204   : > { %p866_p6 = scmp.lt.s32.totalorder %s864_s10, %s860_s5 }
 0x205   : > { %p862_p9 = pnand %p861_p4, %p1157_p13 }
 0x206   : > { %p867_p11 = por %p866_p6, %p865_p0 }
 0x207   : > { %p863_p7 = pneg %p862_p9 }
 0x209   : > { %p868_p12 = pnand %p867_p11, %p863_p7 }
 0x20b   : > { %871 = shalt.err (!%p868_p12)
}
 0x20c   : > { %758 = dma.vmem_to_hbm [thread:$0]  (%p1157_p13), %s617_s24, 32, %s614_s13, %s598_s18   ;;  %vm595_vm6 = vcmask 3072  }
 0x20d   : > { %s736_s25 = sshll.u32 %s1068_s21, 2 }
 0x20e   : > { %s326_s19 = scalar_lea.vmem %s1146_s7, %s736_s25 }
 0x289   : > { %v570_v60 = vpop.xlane.xlu0 %569 }
 0x28a   : > { %v571_v61 = vmul.f32 0.00390625, %v570_v60 }
 0x28c   : > { %596 = vst.msk [vmem:[%s326_s19] sm:$0xf] %vm595_vm6, %v571_v61 }
 0x28d PF: > { %s631_s20 = sand.u32 1, %s898_s26   ;;  %p1158_p1 = scmp.ne.s32.totalorder %s1152_s15, 0 }
 0x28e   : > { %p1159_p3 = scmp.ge.s32.totalorder %s910_s29, 2  ;;  %s632_s14 = scalar_lea.sflag [#allocation5], %s631_s20 }
 0x290   : > { %p765_p5 = pnand %p1159_p3, %p1158_p1 }
 0x292   : > { %p766_p8 = pneg %p765_p5 }
 0x294   : > { %893 = dma.done.wait (%p766_p8), %s632_s14, 32  }
 0x295   : > { %895 = vsyncadd (%p766_p8), %s632_s14, 4294967264  ;;  %p22_p13 = scmp.ge.s32.totalorder %s985_s8, 4   ;;  %s1160_s26 = smov %s902_s27 }
 0x296   : > { %s1161_s27 = smov %s906_s28  ;;  %s1162_s28 = smov %s997_s11 }
 0x297   : > { %s1163_s29 = smov %s985_s8  ;;  %24 = sbr.rel (!%p22_p13) target bundleno = 7 (0x7), region = 104 }
 0x29c   :  { %644 = vsyncpa [#allocation4], 1 }
 0x29d   :  { %646 = vsyncpa [#allocation4 + $0x1], 1 }
 0x29e   :  { %647 = vsyncpa [#allocation5], 1 }
 0x29f   :  { %649 = vsyncpa [#allocation5 + $0x1], 1 }

</bundles_post_ra>
